<compile_context>
chip_gen: v6e
topology: v6e:2x2x1
jax: 0.10.0
libtpu: 0.0.40
codegen_flags: <defaults>
</compile_context>

<pallas_src>
import jax
import jax.numpy as jnp
from jax.experimental import pallas as pl
from jax.experimental.pallas import tpu as pltpu


def _copy_kernel(x_ref, o_ref):
    # Pure lane-dense VMEM tile copy; nothing inside the body matters for a
    # bandwidth-bound copy, only the DMA/tiling around it.
    o_ref[...] = x_ref[...]


def _cdiv(a, b):
    return (a + b - 1) // b


def _round_up(a, m):
    return _cdiv(a, m) * m


def _sublane_step(dtype):
    """Minimum row granularity so packed vregs are full: (8,128) f32,
    (16,128) bf16/fp16, (32,128) int8/fp8."""
    itemsize = jnp.dtype(dtype).itemsize
    if itemsize >= 4:
        return 8
    if itemsize == 2:
        return 16
    return 32


def _lane_dense_cols(n, max_cols=4096):
    """Largest multiple-of-128 divisor of n, capped at max_cols.  Guarantees
    unmasked lane-dense `vst` stores.  Returns None if n is not a multiple of
    128 (caller falls back to the metadata path)."""
    hi = min(max_cols, n)
    hi -= hi % 128
    for c in range(hi, 127, -128):
        if n % c == 0:
            return c
    return None


def _vmem_budget():
    """(per-buffer tile budget, vmem_limit_bytes).  Default is safe on every
    generation (4 double-buffered buffers of 8 MiB = 32 MiB, 48 MiB limit fits
    v7x's 64 MiB physical VMEM).  On v5e/v6e (128 MiB physical) go bigger."""
    budget, limit = 8 << 20, 48 << 20
    try:
        cap = getattr(pltpu.get_tpu_info(), "vmem_capacity_bytes", None)
        if cap is not None and cap >= (100 << 20):   # v5e / v6e
            budget, limit = 16 << 20, 80 << 20
    except Exception:
        pass
    return budget, limit


def _choose_tile_rows(rows, cols, itemsize, step, budget_bytes, min_grid=4):
    """Row tile: multiple of `step`, bounded by the per-buffer VMEM budget,
    and small enough to keep >= min_grid grid steps (pipelining + v7x megacore
    sharding) when rows allow it.  The last grid step may be ragged."""
    if rows <= step:
        return rows                      # full-extent block dim is always legal
    bytes_per_row = cols * itemsize
    by_budget = max(step, (budget_bytes // bytes_per_row) // step * step)
    by_grid = _round_up(_cdiv(rows, min_grid), step)
    return max(step, min(by_budget, by_grid))


def unsqueeze_pallas(x, dim, materialize=True, donate_input=False):
    """Pallas equivalent of torch.Tensor.unsqueeze(dim).

    materialize=False (or any case the copy cannot be done lane-dense) uses
    the zero-cost metadata reshape, which is the true production optimum.
    donate_input=True aliases the output onto the input HBM buffer
    (halves peak HBM footprint when the caller no longer needs `x`).
    """
    ndim = x.ndim
    if dim < 0:
        dim += ndim + 1                  # PyTorch allows dim in [-ndim-1, ndim]
    assert 0 <= dim <= ndim, f"invalid unsqueeze dim {dim} for rank {ndim}"
    out_shape = x.shape[:dim] + (1,) + x.shape[dim:]

    if not materialize:
        return jnp.expand_dims(x, dim)

    n = x.size
    itemsize = jnp.dtype(x.dtype).itemsize
    cols = None if n == 0 else _lane_dense_cols(n)
    if cols is None:
        # Empty input or size not a multiple of 128: a lane-dense 2-D view
        # does not exist and a (1, n) block would waste 7/8 sublanes and risk
        # blowing VMEM — the metadata reshape is strictly better here.
        return jnp.expand_dims(x, dim)

    rows = n // cols
    step = _sublane_step(x.dtype)
    budget_bytes, vmem_limit = _vmem_budget()
    tile_rows = _choose_tile_rows(rows, cols, itemsize, step, budget_bytes)
    grid = (_cdiv(rows, tile_rows),)     # last block may be partial (masked)

    # Row-major flatten of a contiguous array: layout-identical, free.
    x2d = x.reshape(rows, cols)

    flat_out = pl.pallas_call(
        _copy_kernel,
        out_shape=jax.ShapeDtypeStruct((rows, cols), x.dtype),
        grid_spec=pltpu.PrefetchScalarGridSpec(
            num_scalar_prefetch=0,
            grid=grid,
            in_specs=[pl.BlockSpec((tile_rows, cols), lambda i: (i, 0))],
            out_specs=pl.BlockSpec((tile_rows, cols), lambda i: (i, 0)),
        ),
        compiler_params=pltpu.CompilerParams(
            # Independent copy steps: shard across v7x's 2 TensorCores.
            dimension_semantics=("parallel",),
            vmem_limit_bytes=vmem_limit,
        ),
        cost_estimate=pl.CostEstimate(
            flops=0, transcendentals=0, bytes_accessed=2 * n * itemsize),
        input_output_aliases={0: 0} if donate_input else {},
    )(x2d)

    # Metadata-only reshape to the unsqueezed shape (same bytes, new view).
    return flat_out.reshape(out_shape)


def _check(x, dim):
    out = jax.block_until_ready(unsqueeze_pallas(x, dim))
    ref = jnp.expand_dims(x, dim)
    assert out.shape == ref.shape, (out.shape, ref.shape)
    assert out.dtype == ref.dtype, (out.dtype, ref.dtype)
    assert jnp.array_equal(out, ref), "mismatch vs jnp.expand_dims reference"


if __name__ == "__main__":
    key = jax.random.PRNGKey(0)
    k1, k2, k3, k4 = jax.random.split(key, 4)

    # Primary case: small NCHW input, unsqueeze at dim=1 -> (2, 1, 4, 16, 16).
    _check(jax.random.normal(k1, (2, 4, 16, 16), dtype=jnp.float32), 1)

    # Multi-step grid + ragged last tile (rows=20, tile_rows=8 -> grid=3).
    _check(jax.random.normal(k2, (20, 32, 128), dtype=jnp.float32), 0)

    # bf16: dtype-aware 16-row sublane packing, 2-step parallel grid, dim=-1.
    _check(jax.random.normal(k3, (32, 32, 128), dtype=jnp.bfloat16), -1)

    # Size not a multiple of 128: metadata-reshape fallback path.
    _check(jax.random.normal(k4, (3, 5, 7), dtype=jnp.float32), 2)

    print("KERNEL_OK")
</pallas_src>

<mosaic_0001>
module attributes {stable_mosaic.version = 11 : i64} {
  func.func @_copy_kernel(%arg0: i32, %arg1: memref<1x2048xf32, #tpu.memory_space<vmem>>, %arg2: memref<1x2048xf32, #tpu.memory_space<vmem>>) attributes {dimension_semantics = [#tpu.dimension_semantics<parallel>], iteration_bounds = array<i64: 1>, scalar_prefetch = 0 : i64, scratch_operands = 0 : i64, tpu.core_type = #tpu.core_type<tc>, window_params = [{transform_indices = @transform_0, window_bounds = array<i64: 1, 2048>}, {transform_indices = @transform_1, window_bounds = array<i64: 1, 2048>}]} {
    %c0 = arith.constant 0 : index
    %c0_0 = arith.constant 0 : index
    %0 = vector.load %arg1[%c0, %c0_0] : memref<1x2048xf32, #tpu.memory_space<vmem>>, vector<1x2048xf32>
    %c0_1 = arith.constant 0 : index
    %c0_2 = arith.constant 0 : index
    %1 = vector.load %arg2[%c0_1, %c0_2] : memref<1x2048xf32, #tpu.memory_space<vmem>>, vector<1x2048xf32>
    tpu.vector_store %arg2[%c0_1, %c0_2], %0 {strides = array<i32>} : memref<1x2048xf32, #tpu.memory_space<vmem>>, vector<1x2048xf32>,
    return
  }
  func.func @transform_0(%arg0: i32) -> (i32, i32) {
    %c0_i32 = arith.constant 0 : i32
    %c0_i32_0 = arith.constant 0 : i32
    return %arg0, %c0_i32 : i32, i32
  }
  func.func @transform_1(%arg0: i32) -> (i32, i32) {
    %c0_i32 = arith.constant 0 : i32
    %c0_i32_0 = arith.constant 0 : i32
    return %arg0, %c0_i32 : i32, i32
  }
}

</mosaic_0001>

<bundles_post_ra>
// kernel: tpu_custom_call.1
= control target key start
LH: loop header
LB: loop body
LE: loop exit
PB: predicated region body
PF: predicated region fallthrough
CT: control target
= control target key end

     0   :  { %6 = vsyncpa [#allocation3], 0  ;;  %s104_s0 = inlined_call_operand.hbm [shape: f32[1,2048], index: 0, kind: input, shape index: {}]   ;;  %s105_s1 = inlined_call_operand.hbm [shape: f32[1,2048], index: 1, kind: output, shape index: {}]  }
   0x1   :  { %7 = vsyncpa [#allocation4], 0  ;;  %s86_s6 = smov [#allocation2]  }
   0x2   :  { %s14_s7 = sshll.u32 %s86_s6, 4  ;;  %s15_s7 = int_to_ptr.vmem [resolvable:$true] %s14_s7 }
   0x3   :  { %s50_s8 = scalar_lea.vmem %s15_s7, 256  ;;  %p55_p1 = scmp.lt.s32.totalorder %s15_s7, %s15_s7 }
   0x4   :  { %p51_p0 = scmp.ne.s32.totalorder %s15_s7, %s50_s8  ;;  %p56_p2 = scmp.lt.s32.totalorder %s50_s8, %s50_s8 }
   0x6   :  { %p57_p3 = por %p56_p2, %p55_p1 }
   0x8   :  { %p58_p4 = pnand %p57_p3, %p51_p0 }
   0xa   :  { %61 = shalt.err (!%p58_p4)
}
   0xb   :  { %17 = dma.hbm_to_vmem [thread:$0]  %s104_s0, 256, %s15_s7, [#allocation3]  }
   0xc   :  { %82 = dma.done.wait [#allocation3], 256  }
   0xd   :  { %83 = vsyncadd [#allocation3], 4294967040  ;;  %s87_s11 = smov [#allocation5]   ;;  %v21_v0 = vld [vmem:[#allocation2] sm:$0xff]  ;;  %v22_v1 = vld [vmem:[#allocation2 + $0x8] sm:$0xff] }
   0xe   :  { %s31_s12 = sshll.u32 %s87_s11, 4  ;;  %23 = vst [vmem:[#allocation5] sm:$0xff] %v21_v0  ;;  %24 = vst [vmem:[#allocation5 + $0x8] sm:$0xff] %v22_v1  ;;  %s32_s12 = int_to_ptr.vmem [resolvable:$true] %s31_s12 }
   0xf   :  { %s62_s13 = scalar_lea.vmem %s32_s12, 256  ;;  %p67_p6 = scmp.lt.s32.totalorder %s32_s12, %s32_s12 }
  0x10   :  { %p63_p5 = scmp.ne.s32.totalorder %s32_s12, %s62_s13  ;;  %p68_p7 = scmp.lt.s32.totalorder %s62_s13, %s62_s13 }
  0x12   :  { %p69_p8 = por %p68_p7, %p67_p6 }
  0x14   :  { %p70_p9 = pnand %p69_p8, %p63_p5 }
  0x16   :  { %73 = shalt.err (!%p70_p9)
}
  0x17   :  { %34 = dma.vmem_to_hbm [thread:$0]  %s32_s12, 256, %s105_s1, [#allocation4]  }
  0x18   :  { %84 = dma.done.wait [#allocation4], 256  }
  0x19   :  { %85 = vsyncadd [#allocation4], 4294967040 }
  0x1a   :  { %38 = vsyncpa [#allocation3], 1 }
  0x1b   :  { %39 = vsyncpa [#allocation4], 1 }

</bundles_post_ra>
